<compile_context>
chip_gen: v7x
topology: tpu7x:2x2x1
jax: 0.10.0
libtpu: 0.0.40
codegen_flags: <defaults>
</compile_context>

<pallas_src>
import functools
import math

import jax
import jax.numpy as jnp
from jax.experimental import pallas as pl
from jax.experimental.pallas import tpu as pltpu


def _power_kernel(x_ref, o_ref, *, K: int, D: int, g: int):
    """x_ref: (tm, g*D); o_ref: (tm, g*(K+1)*D).

    For each folded sub-row r (g original rows per lane-row), write
    [x_r**0, x_r**1, ..., x_r**K] into its (K+1)*D-wide slot of the output
    block with static sliced stores.
    """
    out_d = (K + 1) * D
    nrows = x_ref.shape[0]
    # Hoisted once (JAX does not CSE broadcast_in_dim inside loops).
    ones = jnp.ones((nrows, D), dtype=o_ref.dtype)
    x = x_ref[...]  # single full-width (unmasked) load of the input block
    for r in range(g):
        base = r * out_d
        o_ref[:, base:base + D] = ones              # x ** 0
        if K >= 1:
            xr = x[:, r * D:(r + 1) * D]
            acc = xr                                # x ** 1
            for k in range(1, K + 1):
                o_ref[:, base + k * D: base + (k + 1) * D] = acc
                if k < K:                           # no wasted final multiply
                    acc = acc * xr


def power_function(x: jax.Array, K: int = 1, *,
                   max_tile_rows: int = 1024,
                   vmem_budget_bytes: int = 24 * 1024 * 1024) -> jax.Array:
    """Pallas implementation of PowerFunction(K).forward(x)."""
    orig_shape = x.shape
    D = orig_shape[-1]
    lead = orig_shape[:-1]
    rows = int(math.prod(lead)) if lead else 1
    out_D = D * (K + 1)

    if rows == 0 or D == 0:
        return jnp.zeros((*lead, out_D), x.dtype)

    # ---- lane folding: make the last dims presented to Pallas 128-aligned ----
    g = 128 // math.gcd(D, 128)          # smallest g with (g*D) % 128 == 0
    if g > 1 and rows % g != 0:
        # TODO(synk): non-divisible row counts fall back to the narrow
        # (masked-store) layout instead of splitting off a remainder kernel.
        g = 1
    R2 = rows // g
    inW, outW = g * D, g * out_D

    itemsize = jnp.dtype(x.dtype).itemsize
    sublane = max(8, 32 // itemsize)     # 8 rows f32, 16 bf16, 32 int8/fp8

    # ---- tile sizing: biggest tile that fits the VMEM budget, dtype-aware ----
    bytes_per_row = 2 * (inW + outW) * itemsize   # double-buffered in + out
    tile_rows = min(max_tile_rows, max(sublane, vmem_budget_bytes // bytes_per_row))
    # Keep a few grid steps on big inputs (v7x has 2 TCs sharding the
    # "parallel" axis), but never shrink tiles below ~256 rows to do so.
    min_steps = 4
    if R2 >= min_steps * 256:
        tile_rows = min(tile_rows, pl.cdiv(R2, min_steps))
    tile_rows = max(sublane, (tile_rows // sublane) * sublane)
    if tile_rows >= R2:
        tile_rows = R2                   # single step; block == full array dims

    grid = (pl.cdiv(R2, tile_rows),)     # no jnp.pad: ragged last block is masked

    footprint = 2 * tile_rows * (inW + outW) * itemsize
    vmem_limit = min(48 * 1024 * 1024,
                     max(16 * 1024 * 1024, footprint + 4 * 1024 * 1024))

    x2 = x.reshape(R2, inW)              # free row-major reshape
    kernel = functools.partial(_power_kernel, K=K, D=D, g=g)

    out2 = pl.pallas_call(
        kernel,
        out_shape=jax.ShapeDtypeStruct((R2, outW), x.dtype),
        grid_spec=pltpu.PrefetchScalarGridSpec(
            num_scalar_prefetch=0,
            grid=grid,
            in_specs=[pl.BlockSpec((tile_rows, inW), lambda i: (i, 0))],
            out_specs=pl.BlockSpec((tile_rows, outW), lambda i: (i, 0)),
        ),
        compiler_params=pltpu.CompilerParams(
            dimension_semantics=("parallel",),
            vmem_limit_bytes=vmem_limit,
        ),
    )(x2)

    return out2.reshape(*lead, out_D)


def power_function_ref(x: jax.Array, K: int = 1) -> jax.Array:
    """Pure-JAX reference matching torch.cat([x**k for k in range(K+1)], -1)."""
    return jnp.concatenate([x ** k for k in range(K + 1)], axis=-1)


if __name__ == "__main__":
    # Primary small shape consistent with convcnp usage: (batch, n_points, feat)
    K = 1  # module default
    key = jax.random.PRNGKey(0)
    x = jax.random.normal(key, (2, 8, 16), dtype=jnp.float32)

    out = power_function(x, K=K)
    jax.block_until_ready(out)

    ref = power_function_ref(x, K=K)
    assert out.shape == (2, 8, 16 * (K + 1)), out.shape
    assert out.dtype == x.dtype
    assert jnp.allclose(out, ref, atol=1e-6, rtol=1e-6), "mismatch vs reference"

    # Exercise the multi-step folded path (grid > 1) and the g=1 fallback path.
    for shape, k2, tol in (((4, 4096, 16), 3, 1e-5), ((3, 7, 16), 2, 1e-6)):
        xb = jax.random.normal(jax.random.PRNGKey(0), shape, dtype=jnp.float32)
        ob = power_function(xb, K=k2)
        jax.block_until_ready(ob)
        rb = power_function_ref(xb, K=k2)
        assert ob.shape == rb.shape, (ob.shape, rb.shape)
        assert jnp.allclose(ob, rb, atol=tol, rtol=tol), f"mismatch for {shape}"

    print("KERNEL_OK")
</pallas_src>

<mosaic_0001>
module attributes {stable_mosaic.version = 11 : i64} {
  func.func @_power_kernel(%arg0: i32, %arg1: memref<2x128xf32, #tpu.memory_space<vmem>>, %arg2: memref<2x256xf32, #tpu.memory_space<vmem>>) attributes {dimension_semantics = [#tpu.dimension_semantics<parallel>], iteration_bounds = array<i64: 1>, scalar_prefetch = 0 : i64, scratch_operands = 0 : i64, tpu.core_type = #tpu.core_type<tc>, window_params = [{transform_indices = @transform_0, window_bounds = array<i64: 2, 128>}, {transform_indices = @transform_1, window_bounds = array<i64: 2, 256>}]} {
    %cst = arith.constant 1.000000e+00 : f32
    %0 = vector.broadcast %cst : f32 to vector<2x16xf32>
    %c0 = arith.constant 0 : index
    %c0_0 = arith.constant 0 : index
    %1 = vector.load %arg1[%c0, %c0_0] : memref<2x128xf32, #tpu.memory_space<vmem>>, vector<2x128xf32>
    %c0_1 = arith.constant 0 : index
    %c0_2 = arith.constant 0 : index
    %2 = vector.load %arg2[%c0_1, %c0_2] : memref<2x256xf32, #tpu.memory_space<vmem>>, vector<2x16xf32>
    tpu.vector_store %arg2[%c0_1, %c0_2], %0 {strides = array<i32>} : memref<2x256xf32, #tpu.memory_space<vmem>>, vector<2x16xf32>,
    %3 = vector.extract_strided_slice %1 {offsets = [0, 0], sizes = [2, 16], strides = [1, 1]} : vector<2x128xf32> to vector<2x16xf32>
    %c0_3 = arith.constant 0 : index
    %c16 = arith.constant 16 : index
    %4 = vector.load %arg2[%c0_3, %c16] : memref<2x256xf32, #tpu.memory_space<vmem>>, vector<2x16xf32>
    tpu.vector_store %arg2[%c0_3, %c16], %3 {strides = array<i32>} : memref<2x256xf32, #tpu.memory_space<vmem>>, vector<2x16xf32>,
    %c0_4 = arith.constant 0 : index
    %c32 = arith.constant 32 : index
    %5 = vector.load %arg2[%c0_4, %c32] : memref<2x256xf32, #tpu.memory_space<vmem>>, vector<2x16xf32>
    tpu.vector_store %arg2[%c0_4, %c32], %0 {strides = array<i32>} : memref<2x256xf32, #tpu.memory_space<vmem>>, vector<2x16xf32>,
    %6 = vector.extract_strided_slice %1 {offsets = [0, 16], sizes = [2, 16], strides = [1, 1]} : vector<2x128xf32> to vector<2x16xf32>
    %c0_5 = arith.constant 0 : index
    %c48 = arith.constant 48 : index
    %7 = vector.load %arg2[%c0_5, %c48] : memref<2x256xf32, #tpu.memory_space<vmem>>, vector<2x16xf32>
    tpu.vector_store %arg2[%c0_5, %c48], %6 {strides = array<i32>} : memref<2x256xf32, #tpu.memory_space<vmem>>, vector<2x16xf32>,
    %c0_6 = arith.constant 0 : index
    %c64 = arith.constant 64 : index
    %8 = vector.load %arg2[%c0_6, %c64] : memref<2x256xf32, #tpu.memory_space<vmem>>, vector<2x16xf32>
    tpu.vector_store %arg2[%c0_6, %c64], %0 {strides = array<i32>} : memref<2x256xf32, #tpu.memory_space<vmem>>, vector<2x16xf32>,
    %9 = vector.extract_strided_slice %1 {offsets = [0, 32], sizes = [2, 16], strides = [1, 1]} : vector<2x128xf32> to vector<2x16xf32>
    %c0_7 = arith.constant 0 : index
    %c80 = arith.constant 80 : index
    %10 = vector.load %arg2[%c0_7, %c80] : memref<2x256xf32, #tpu.memory_space<vmem>>, vector<2x16xf32>
    tpu.vector_store %arg2[%c0_7, %c80], %9 {strides = array<i32>} : memref<2x256xf32, #tpu.memory_space<vmem>>, vector<2x16xf32>,
    %c0_8 = arith.constant 0 : index
    %c96 = arith.constant 96 : index
    %11 = vector.load %arg2[%c0_8, %c96] : memref<2x256xf32, #tpu.memory_space<vmem>>, vector<2x16xf32>
    tpu.vector_store %arg2[%c0_8, %c96], %0 {strides = array<i32>} : memref<2x256xf32, #tpu.memory_space<vmem>>, vector<2x16xf32>,
    %12 = vector.extract_strided_slice %1 {offsets = [0, 48], sizes = [2, 16], strides = [1, 1]} : vector<2x128xf32> to vector<2x16xf32>
    %c0_9 = arith.constant 0 : index
    %c112 = arith.constant 112 : index
    %13 = vector.load %arg2[%c0_9, %c112] : memref<2x256xf32, #tpu.memory_space<vmem>>, vector<2x16xf32>
    tpu.vector_store %arg2[%c0_9, %c112], %12 {strides = array<i32>} : memref<2x256xf32, #tpu.memory_space<vmem>>, vector<2x16xf32>,
    %c0_10 = arith.constant 0 : index
    %c128 = arith.constant 128 : index
    %14 = vector.load %arg2[%c0_10, %c128] : memref<2x256xf32, #tpu.memory_space<vmem>>, vector<2x16xf32>
    tpu.vector_store %arg2[%c0_10, %c128], %0 {strides = array<i32>} : memref<2x256xf32, #tpu.memory_space<vmem>>, vector<2x16xf32>,
    %15 = vector.extract_strided_slice %1 {offsets = [0, 64], sizes = [2, 16], strides = [1, 1]} : vector<2x128xf32> to vector<2x16xf32>
    %c0_11 = arith.constant 0 : index
    %c144 = arith.constant 144 : index
    %16 = vector.load %arg2[%c0_11, %c144] : memref<2x256xf32, #tpu.memory_space<vmem>>, vector<2x16xf32>
    tpu.vector_store %arg2[%c0_11, %c144], %15 {strides = array<i32>} : memref<2x256xf32, #tpu.memory_space<vmem>>, vector<2x16xf32>,
    %c0_12 = arith.constant 0 : index
    %c160 = arith.constant 160 : index
    %17 = vector.load %arg2[%c0_12, %c160] : memref<2x256xf32, #tpu.memory_space<vmem>>, vector<2x16xf32>
    tpu.vector_store %arg2[%c0_12, %c160], %0 {strides = array<i32>} : memref<2x256xf32, #tpu.memory_space<vmem>>, vector<2x16xf32>,
    %18 = vector.extract_strided_slice %1 {offsets = [0, 80], sizes = [2, 16], strides = [1, 1]} : vector<2x128xf32> to vector<2x16xf32>
    %c0_13 = arith.constant 0 : index
    %c176 = arith.constant 176 : index
    %19 = vector.load %arg2[%c0_13, %c176] : memref<2x256xf32, #tpu.memory_space<vmem>>, vector<2x16xf32>
    tpu.vector_store %arg2[%c0_13, %c176], %18 {strides = array<i32>} : memref<2x256xf32, #tpu.memory_space<vmem>>, vector<2x16xf32>,
    %c0_14 = arith.constant 0 : index
    %c192 = arith.constant 192 : index
    %20 = vector.load %arg2[%c0_14, %c192] : memref<2x256xf32, #tpu.memory_space<vmem>>, vector<2x16xf32>
    tpu.vector_store %arg2[%c0_14, %c192], %0 {strides = array<i32>} : memref<2x256xf32, #tpu.memory_space<vmem>>, vector<2x16xf32>,
    %21 = vector.extract_strided_slice %1 {offsets = [0, 96], sizes = [2, 16], strides = [1, 1]} : vector<2x128xf32> to vector<2x16xf32>
    %c0_15 = arith.constant 0 : index
    %c208 = arith.constant 208 : index
    %22 = vector.load %arg2[%c0_15, %c208] : memref<2x256xf32, #tpu.memory_space<vmem>>, vector<2x16xf32>
    tpu.vector_store %arg2[%c0_15, %c208], %21 {strides = array<i32>} : memref<2x256xf32, #tpu.memory_space<vmem>>, vector<2x16xf32>,
    %c0_16 = arith.constant 0 : index
    %c224 = arith.constant 224 : index
    %23 = vector.load %arg2[%c0_16, %c224] : memref<2x256xf32, #tpu.memory_space<vmem>>, vector<2x16xf32>
    tpu.vector_store %arg2[%c0_16, %c224], %0 {strides = array<i32>} : memref<2x256xf32, #tpu.memory_space<vmem>>, vector<2x16xf32>,
    %24 = vector.extract_strided_slice %1 {offsets = [0, 112], sizes = [2, 16], strides = [1, 1]} : vector<2x128xf32> to vector<2x16xf32>
    %c0_17 = arith.constant 0 : index
    %c240 = arith.constant 240 : index
    %25 = vector.load %arg2[%c0_17, %c240] : memref<2x256xf32, #tpu.memory_space<vmem>>, vector<2x16xf32>
    tpu.vector_store %arg2[%c0_17, %c240], %24 {strides = array<i32>} : memref<2x256xf32, #tpu.memory_space<vmem>>, vector<2x16xf32>,
    return
  }
  func.func @transform_0(%arg0: i32) -> (i32, i32) {
    %c0_i32 = arith.constant 0 : i32
    %c0_i32_0 = arith.constant 0 : i32
    return %arg0, %c0_i32 : i32, i32
  }
  func.func @transform_1(%arg0: i32) -> (i32, i32) {
    %c0_i32 = arith.constant 0 : i32
    %c0_i32_0 = arith.constant 0 : i32
    return %arg0, %c0_i32 : i32, i32
  }
}

</mosaic_0001>

<bundles_post_ra>
// kernel: tpu_custom_call.1
= control target key start
LH: loop header
LB: loop body
LE: loop exit
PB: predicated region body
PF: predicated region fallthrough
CT: control target
= control target key end

     0   :  { %6 = vsyncpa [#allocation3], 0  ;;  %s194_s0 = inlined_call_operand.hbm [shape: f32[2,128], index: 0, kind: input, shape index: {}]   ;;  %s195_s1 = inlined_call_operand.hbm [shape: f32[2,256], index: 1, kind: output, shape index: {}]  }
   0x1   :  { %7 = vsyncpa [#allocation4], 0  ;;  %s149_s6 = smov [#allocation2]   ;;  %s101_s10 = scalar_lea.hbm %s194_s0, 32 }
   0x2   :  { %s14_s7 = sshll.u32 %s149_s6, 4  ;;  %p102_p0 = scmp.ne.s32.totalorder %s194_s0, %s101_s10  ;;  %s15_s7 = int_to_ptr.vmem [resolvable:$true] %s14_s7 }
   0x3   :  { %p105_p1 = scmp.lt.u32.totalorder %s101_s10, %s194_s0 }
   0x5   :  { %p107_p2 = pnand %p105_p1, %p102_p0 }
   0x7   :  { %110 = shalt.err (!%p107_p2)
}
   0x8   :  { %s111_s15 = scalar_lea.vmem %s15_s7, 32  ;;  %p116_p4 = scmp.lt.s32.totalorder %s15_s7, %s15_s7 }
   0x9   :  { %p112_p3 = scmp.ne.s32.totalorder %s15_s7, %s111_s15  ;;  %p117_p5 = scmp.lt.s32.totalorder %s111_s15, %s111_s15 }
   0xb   :  { %p118_p6 = por %p117_p5, %p116_p4 }
   0xd   :  { %p119_p7 = pnand %p118_p6, %p112_p3 }
   0xf   :  { %122 = shalt.err (!%p119_p7)
}
  0x10   :  { %17 = dma.hbm_to_vmem [thread:$0]  %s194_s0, 32, %s15_s7, [#allocation3]  }
  0x11   :  { %145 = dma.done.wait [#allocation3], 32  }
  0x12   :  { %146 = vsyncadd [#allocation3], 4294967264  ;;  %v28_v0 = vlaneseq  ;;  %v150_v1 = vmov 1983009808   ;;  %vm22_vm0 = vcmask 123904   ;;  %v151_v4 = vmov 1.0  }
  0x13   :  { %v26_v2 = vunpack.c.l.s4 %v150_v1  ;;  %23 = vst.msk [vmem:[#allocation5] sm:$0x3] %vm22_vm0, %v151_v4  ;;  %58 = vst.msk [vmem:[#allocation5 + $0x2] sm:$0x3] %vm22_vm0, %v151_v4  ;;  %v21_v7 = vld [vmem:[#allocation2] sm:$0x3] }
  0x14   :  { %v29_v3 = vshrl.u32 %v28_v0, 7  ;;  %s152_s18 = smov 16   ;;  %s153_s19 = smov 32   ;;  %vm35_vm1 = vcmask 255104   ;;  %vm37_vm2 = vcmask 386304   ;;  %vm42_vm3 = vcmask 517504  }
  0x15   :  { %v27_v5 = vunpack.c.0.s8 %v26_v2  ;;  %s154_s20 = smov 80   ;;  %s155_s0 = smov 96   ;;  %vm44_vm4 = vcmask 648704   ;;  %vm49_vm5 = vcmask 779904   ;;  %vm51_vm6 = vcmask 911104  }
  0x16   :  { %s156_s21 = smov 48   ;;  %s157_s22 = smov 112   ;;  %vm56_vm7 = vcmask 1042304  }
  0x17   :  { %v30_v6 = vsub.s32 %v27_v5, %v29_v3  ;;  %s158_s23 = smov 64   ;;  %s159_s24 = smov [#allocation5]  }
  0x18   :  { %s81_s25 = sshll.u32 %s159_s24, 4  ;;  %s82_s25 = int_to_ptr.vmem [resolvable:$true] %s81_s25 }
  0x19   :  { %v31_v8 = vrot.slane %v21_v7, %v30_v6  ;;  %s123_s26 = scalar_lea.vmem %s82_s25, 64  ;;  %p128_p9 = scmp.lt.s32.totalorder %s82_s25, %s82_s25 }
  0x1a   :  { %p124_p8 = scmp.ne.s32.totalorder %s82_s25, %s123_s26  ;;  %p129_p10 = scmp.lt.s32.totalorder %s123_s26, %s123_s26 }
  0x1b   :  { %32 = vrot.lane.b32.xlu0 %v31_v8, %s152_s18  ;;  %39 = vrot.lane.b32.xlu1 %v31_v8, %s153_s19 }
  0x1c   :  { %p130_p11 = por %p129_p10, %p128_p9 }
  0x1e   :  { %p131_p12 = pnand %p130_p11, %p124_p8 }
  0x1f   :  { %59 = vrot.lane.b32.xlu0 %v31_v8, %s154_s20  ;;  %64 = vrot.lane.b32.xlu1 %v31_v8, %s155_s0 }
  0x23   :  { %46 = vrot.lane.b32.xlu0 %v31_v8, %s156_s21  ;;  %69 = vrot.lane.b32.xlu1 %v31_v8, %s157_s22 }
  0x27   :  { %53 = vrot.lane.b32.xlu0 %v31_v8, %s158_s23 }
  0x8d   :  { %v33_v9 = vpop.permute.xlu0 %32  ;;  %v40_v10 = vpop.permute.xlu1 %39 }
  0x8e   :  { %36 = vst.msk [vmem:[#allocation5] sm:$0x3] %vm35_vm1, %v33_v9 }
  0x8f   :  { %38 = vst.msk [vmem:[#allocation5] sm:$0x3] %vm37_vm2, %v151_v4 }
  0x90   :  { %43 = vst.msk [vmem:[#allocation5] sm:$0x3] %vm42_vm3, %v40_v10 }
  0x91   :  { %v60_v11 = vpop.permute.xlu0 %59  ;;  %v65_v12 = vpop.permute.xlu1 %64  ;;  %45 = vst.msk [vmem:[#allocation5] sm:$0x3] %vm44_vm4, %v151_v4 }
  0x92   :  { %62 = vst.msk [vmem:[#allocation5 + $0x2] sm:$0x3] %vm35_vm1, %v60_v11 }
  0x93   :  { %63 = vst.msk [vmem:[#allocation5 + $0x2] sm:$0x3] %vm37_vm2, %v151_v4 }
  0x94   :  { %67 = vst.msk [vmem:[#allocation5 + $0x2] sm:$0x3] %vm42_vm3, %v65_v12 }
  0x95   :  { %v47_v13 = vpop.permute.xlu0 %46  ;;  %68 = vst.msk [vmem:[#allocation5 + $0x2] sm:$0x3] %vm44_vm4, %v151_v4  ;;  %v70_v14 = vpop.permute.xlu1 %69 }
  0x96   :  { %50 = vst.msk [vmem:[#allocation5] sm:$0x3] %vm49_vm5, %v47_v13  ;;  %72 = vst.msk [vmem:[#allocation5 + $0x2] sm:$0x3] %vm49_vm5, %v70_v14 }
  0x97   :  { %52 = vst.msk [vmem:[#allocation5] sm:$0x3] %vm51_vm6, %v151_v4  ;;  %73 = vst.msk [vmem:[#allocation5 + $0x2] sm:$0x3] %vm51_vm6, %v151_v4 }
  0x98   :  { %74 = vst.msk [vmem:[#allocation5 + $0x2] sm:$0x3] %vm56_vm7, %v21_v7 }
  0x99   :  { %v54_v15 = vpop.permute.xlu0 %53 }
  0x9a   :  { %57 = vst.msk [vmem:[#allocation5] sm:$0x3] %vm56_vm7, %v54_v15 }
  0x9b   :  { %134 = shalt.err (!%p131_p12)
}
  0x9c   :  { %s135_s29 = scalar_lea.hbm %s195_s1, 64 }
  0x9d   :  { %p136_p13 = scmp.ne.s32.totalorder %s195_s1, %s135_s29  ;;  %p139_p0 = scmp.lt.u32.totalorder %s135_s29, %s195_s1 }
  0x9f   :  { %p141_p1 = pnand %p139_p0, %p136_p13 }
  0xa1   :  { %144 = shalt.err (!%p141_p1)
}
  0xa2   :  { %84 = dma.vmem_to_hbm [thread:$0]  %s82_s25, 64, %s195_s1, [#allocation4]  }
  0xa3   :  { %147 = dma.done.wait [#allocation4], 64  }
  0xa4   :  { %148 = vsyncadd [#allocation4], 4294967232 }
  0xa5   :  { %88 = vsyncpa [#allocation3], 1 }
  0xa6   :  { %89 = vsyncpa [#allocation4], 1 }

</bundles_post_ra>
